<compile_context>
chip_gen: v7x
topology: tpu7x:2x2x1
jax: 0.10.0
libtpu: 0.0.40
codegen_flags: <defaults>
</compile_context>

<pallas_src>
import jax
import jax.numpy as jnp
from jax import lax
from jax.experimental import pallas as pl
from jax.experimental.pallas import tpu as pltpu

_LANE = 128
_SUBLANE = 8
_WEIGHT_CACHE = {}


def _round_up(v: int, m: int) -> int:
    return ((v + m - 1) // m) * m


# ----------------------------------------------------------------------------
# Interpolation matrices (built in plain JAX, cached per shape/dtype).
# ----------------------------------------------------------------------------
def _bilinear_weight_matrix(out_size: int, in_size: int) -> jnp.ndarray:
    """W (out_size, in_size) with W @ v == bilinear resize of v along that axis
    (half-pixel centers, align_corners=False, edge-clamped)."""
    scale = in_size / out_size
    dst = jnp.arange(out_size, dtype=jnp.float32)
    src = (dst + 0.5) * scale - 0.5
    src = jnp.clip(src, 0.0, float(in_size - 1))
    lo = jnp.floor(src).astype(jnp.int32)
    hi = jnp.minimum(lo + 1, in_size - 1)
    frac = src - lo.astype(jnp.float32)
    rows = jnp.arange(out_size)
    w = jnp.zeros((out_size, in_size), dtype=jnp.float32)
    w = w.at[rows, lo].add(1.0 - frac)
    w = w.at[rows, hi].add(frac)
    return w


def _get_weights(h_out, h_in, w_out, w_in, h_out_p, w_out_p, compute_dtype):
    key = (h_out, h_in, w_out, w_in, h_out_p, w_out_p,
           jnp.dtype(compute_dtype).name)
    hit = _WEIGHT_CACHE.get(key)
    if hit is not None:
        return hit
    wh = _bilinear_weight_matrix(h_out, h_in)                # (H_out, H_in)
    if h_out_p != h_out:                                     # sublane pad (zeros)
        wh = jnp.pad(wh, ((0, h_out_p - h_out), (0, 0)))
    ww_t = _bilinear_weight_matrix(w_out, w_in).T            # (W_in, W_out)
    if w_out_p != w_out:                                     # lane pad (zeros)
        ww_t = jnp.pad(ww_t, ((0, 0), (0, w_out_p - w_out)))
    wh = wh.astype(compute_dtype)
    ww_t = ww_t.astype(compute_dtype)
    _WEIGHT_CACHE[key] = (wh, ww_t)
    return wh, ww_t


# ----------------------------------------------------------------------------
# Hardware queries (best-effort, safe fallbacks).
# ----------------------------------------------------------------------------
def _vmem_capacity_bytes() -> int:
    try:
        return int(pltpu.get_tpu_info().vmem_capacity_bytes)
    except Exception:
        return 64 * 1024 * 1024      # conservative (v7x per-core VMEM)


def _num_tensorcores() -> int:
    try:
        dev = jax.devices()[0]
        for attr in ("num_cores", "core_count"):
            v = getattr(dev, attr, None)
            if isinstance(v, int) and 0 < v <= 8:
                return v
        kind = str(getattr(dev, "device_kind", "")).lower()
        if "v7" in kind or "7x" in kind:
            return 2
    except Exception:
        pass
    return 1


# ----------------------------------------------------------------------------
# Pallas kernel: TB image planes -> TB resized planes via two MXU passes.
# ----------------------------------------------------------------------------
def _make_resize_kernel(rows_first: bool, compute_dtype, round_output: bool):
    def _finalize(z, ref_dtype):
        if round_output:
            # convex combination -> in range, but clamp anyway for safety
            z = jnp.round(z)
            info = jnp.iinfo(ref_dtype)
            z = jnp.clip(z, info.min, info.max)
        return z.astype(ref_dtype)

    def kernel(x_ref, wh_ref, wwt_ref, o_ref, mid_ref):
        # x_ref  : (TB, H_in, W_in)
        # wh_ref : (H_out_p, H_in)      row-interp matrix, sublane-padded rows
        # wwt_ref: (W_in, W_out_p)      pre-transposed, lane-padded col matrix
        # o_ref  : (TB, H_out_p, W_out_p)
        # mid_ref: (TB, H_mid, W_mid)   pass-1 intermediate (compute dtype)
        tb, h_in, w_in = x_ref.shape
        h_out_p = wh_ref.shape[0]
        w_out_p = wwt_ref.shape[1]
        unroll = bool(tb <= 8)

        wh = wh_ref[...]
        wwt = wwt_ref[...]

        if rows_first:
            # Pass 1 (H resize): per-plane (H_out_p, H_in) @ (H_in, W_in)
            # matmuls sharing the single Wh operand (no broadcast copies).
            def row_body(t, carry):
                xt = x_ref[t]
                if xt.dtype != compute_dtype:
                    xt = xt.astype(compute_dtype)
                yt = jnp.dot(wh, xt, preferred_element_type=jnp.float32)
                mid_ref[t] = yt.astype(mid_ref.dtype)
                return carry
            lax.fori_loop(0, tb, row_body, 0, unroll=unroll)

            # Pass 2 (W resize): ONE tall lane-dense MXU matmul fused over all
            # planes; the (TB,H_out_p,W_in)->(TB*H_out_p,W_in) collapse is a
            # layout no-op because H_out_p % 8 == 0.
            mid = mid_ref[...].reshape(tb * h_out_p, w_in)
            z = jnp.dot(mid, wwt, preferred_element_type=jnp.float32)
            z = z.reshape(tb, h_out_p, w_out_p)
            o_ref[...] = _finalize(z, o_ref.dtype)
        else:
            # Pass 1 (W resize): ONE tall lane-dense matmul (H_in % 8 == 0
            # guaranteed by the wrapper's pass-order choice).
            x = x_ref[...]
            if x.dtype != compute_dtype:
                x = x.astype(compute_dtype)
            y = jnp.dot(x.reshape(tb * h_in, w_in), wwt,
                        preferred_element_type=jnp.float32)
            mid_ref[...] = y.reshape(tb, h_in, w_out_p).astype(mid_ref.dtype)

            # Pass 2 (H resize): per-plane matmuls, lane/sublane-aligned stores.
            def col_body(t, carry):
                zt = jnp.dot(wh, mid_ref[t], preferred_element_type=jnp.float32)
                o_ref[t] = _finalize(zt, o_ref.dtype)
                return carry
            lax.fori_loop(0, tb, col_body, 0, unroll=unroll)

    return kernel


# ----------------------------------------------------------------------------
# Wrapper: padding / tiling / block-size selection + pallas_call.
# ----------------------------------------------------------------------------
def resize_image_pallas(x: jnp.ndarray, shape, *, bf16_compute: bool = False):
    """Bilinear resize of NCHW tensor `x` to spatial `shape` via Pallas."""
    if isinstance(shape, int):
        shape = (shape, shape)
    h_out, w_out = int(shape[0]), int(shape[1])
    n, c, h_in, w_in = x.shape
    b = n * c

    out_dtype = x.dtype
    if x.dtype == jnp.bfloat16 or bf16_compute:
        compute_dtype = jnp.bfloat16
    else:
        compute_dtype = jnp.float32
    round_output = bool(jnp.issubdtype(out_dtype, jnp.integer))

    # Fully lane/sublane-padded output tile (review items 1 & 2).
    w_out_p = _round_up(w_out, _LANE)       # unmasked vst on the lane dim
    h_out_p = _round_up(h_out, _SUBLANE)    # aligned second-minor dim

    # Static pass-order choice (minimize actual MXU work on padded dims).
    flops_rows_first = h_out_p * h_in * w_in + h_out_p * w_in * w_out_p
    flops_cols_first = h_in * w_in * w_out_p + h_out_p * h_in * w_out_p
    rows_first = flops_rows_first <= flops_cols_first
    # cols-first fuses pass 1 via a (tb*H_in, W_in) collapse, a layout no-op
    # only if H_in % 8 == 0; otherwise use rows-first (its fused pass runs
    # over the already 8-padded H_out_p).
    if h_in % _SUBLANE != 0:
        rows_first = True
    h_mid, w_mid = (h_out_p, w_in) if rows_first else (h_in, w_out_p)

    wh, ww_t = _get_weights(h_out, h_in, w_out, w_in,
                            h_out_p, w_out_p, compute_dtype)

    # ---- honest VMEM accounting + generation-aware plane-batch (TB) ---------
    in_item = int(jnp.dtype(x.dtype).itemsize)
    out_item = int(jnp.dtype(out_dtype).itemsize)
    cdt_item = int(jnp.dtype(compute_dtype).itemsize)

    wh_bytes = h_out_p * h_in * cdt_item
    wwt_bytes = w_in * w_out_p * cdt_item
    # Weight blocks are double-buffered by default even though their block
    # index is constant; count 2x buffers + 1x loaded values.
    fixed_bytes = 3 * (wh_bytes + wwt_bytes)

    per_plane_bytes = (
        2 * h_in * w_in * in_item            # double-buffered input block
        + 2 * h_out_p * w_out_p * out_item   # double-buffered output block
        + h_mid * w_mid * cdt_item           # mid scratch
        + h_mid * w_mid * 4                  # pass-1 f32 accumulator value
        + h_out_p * w_out_p * 4              # pass-2 f32 accumulator value
        + (0 if (rows_first or compute_dtype == x.dtype)
           else h_in * w_in * cdt_item))     # cast copy of x block (cols-first)

    vmem_cap = _vmem_capacity_bytes()        # ~128 MiB v5e/v6e, ~64 MiB v7x
    vmem_limit = int(0.75 * vmem_cap)        # don't throw away half of 128 MiB
    budget = int(0.85 * vmem_limit) - fixed_bytes

    tb = max(1, min(b, budget // per_plane_bytes))

    # Grid-step policy: 1-TC parts (v5e/v6e) take the largest TB that fits;
    # multi-TC parts (v7x) keep >= 2 steps per core so DMA can overlap compute.
    n_cores = _num_tensorcores()
    if n_cores > 1 and b >= 2 * n_cores:
        tb = min(tb, max(1, b // (2 * n_cores)))

    # Prefer a TB that divides b exactly (no wasted ragged final block), unless
    # the best divisor is much smaller than the budget allows.
    if b % tb != 0:
        best = 1
        for d in range(tb, 0, -1):
            if b % d == 0:
                best = d
                break
        if best * 2 >= tb:
            tb = best
    tb = int(tb)

    grid = (pl.cdiv(b, tb),)
    x_flat = x.reshape(b, h_in, w_in)

    flops_plane = flops_rows_first if rows_first else flops_cols_first
    cost = pl.CostEstimate(
        flops=2 * b * flops_plane,
        transcendentals=0,
        bytes_accessed=(b * h_in * w_in * in_item
                        + b * h_out_p * w_out_p * out_item
                        + wh_bytes + wwt_bytes),
    )

    kernel = _make_resize_kernel(rows_first, compute_dtype, round_output)

    out_flat = pl.pallas_call(
        kernel,
        out_shape=jax.ShapeDtypeStruct((b, h_out_p, w_out_p), out_dtype),
        grid_spec=pltpu.PrefetchScalarGridSpec(
            num_scalar_prefetch=0,
            grid=grid,
            in_specs=[
                # last two dims equal the full array dims -> no (8,128) issue
                pl.BlockSpec((tb, h_in, w_in), lambda i: (i, 0, 0)),
                pl.BlockSpec((h_out_p, h_in), lambda i: (0, 0)),
                pl.BlockSpec((w_in, w_out_p), lambda i: (0, 0)),
            ],
            out_specs=pl.BlockSpec((tb, h_out_p, w_out_p), lambda i: (i, 0, 0)),
            scratch_shapes=[pltpu.VMEM((tb, h_mid, w_mid), compute_dtype)],
        ),
        compiler_params=pltpu.CompilerParams(
            dimension_semantics=("parallel",),
            vmem_limit_bytes=vmem_limit),
        cost_estimate=cost,
    )(x_flat, wh, ww_t)

    out_flat = out_flat[:, :h_out, :w_out]
    return out_flat.reshape(n, c, h_out, w_out)


# ----------------------------------------------------------------------------
# Module port (stateful shape cycling stays in Python).
# ----------------------------------------------------------------------------
class AlternatingResize:
    """JAX port of the PyTorch AlternatingResize module; the resize itself is
    the Pallas kernel above."""

    def __init__(self, shape_list, frequency, logger=None):
        self._index = 0
        self._logger = logger
        self._shape_list = shape_list
        if isinstance(frequency, int):
            self._freqency_list = [frequency for _ in range(len(shape_list))]
        else:
            assert len(frequency) == len(self._shape_list)
            self._freqency_list = frequency
        self._expanded_shape_list = []
        for _shape, _time in zip(self._shape_list, self._freqency_list):
            if isinstance(_shape, int):
                _shape = (_shape, _shape)
            self._expanded_shape_list.extend([_shape for _ in range(_time)])
        self._current_shape = self._expanded_shape_list[self._index]

    def next_shape(self):
        self._current_shape = self._expanded_shape_list[self._index]
        self._index = (self._index + 1) % len(self._expanded_shape_list)

    def __call__(self, *args):
        if len(args) == 1:
            return resize_image_pallas(args[0], self._current_shape)
        else:
            return (resize_image_pallas(args[0], self._current_shape), *args[1:])


if __name__ == "__main__":
    key = jax.random.PRNGKey(0)
    # small NCHW input consistent with an image-resize forward
    x = jax.random.normal(key, (2, 4, 16, 16), dtype=jnp.float32)

    module = AlternatingResize(shape_list=[24, (20, 28)], frequency=1)

    # shape (24, 24): rows-first, fused flat column pass (H_out % 8 == 0)
    out = jax.block_until_ready(module(x))
    assert out.shape == (2, 4, 24, 24), out.shape
    ref = jax.image.resize(x, (2, 4, 24, 24), method="linear")
    assert jnp.allclose(out, ref, atol=1e-4, rtol=1e-4)

    # cycle to shape (20, 28): exercises the padded (H_out -> 24) flat path
    module.next_shape()
    module.next_shape()
    out2 = jax.block_until_ready(module(x))
    assert out2.shape == (2, 4, 20, 28), out2.shape
    ref2 = jax.image.resize(x, (2, 4, 20, 28), method="linear")
    assert jnp.allclose(out2, ref2, atol=1e-4, rtol=1e-4)

    # exercise the multi-arg passthrough branch too
    labels = jnp.arange(2, dtype=jnp.int32)
    out3, lab3 = module(x, labels)
    jax.block_until_ready(out3)
    assert out3.shape == (2, 4, 20, 28) and lab3.shape == (2,)

    # strong H upscale with wide W: exercises the cols-first order
    x3 = jax.random.normal(jax.random.PRNGKey(1), (2, 2, 8, 128),
                           dtype=jnp.float32)
    out4 = jax.block_until_ready(resize_image_pallas(x3, 128))
    assert out4.shape == (2, 2, 128, 128), out4.shape
    ref4 = jax.image.resize(x3, (2, 2, 128, 128), method="linear")
    assert jnp.allclose(out4, ref4, atol=1e-4, rtol=1e-4)

    print("KERNEL_OK")
</pallas_src>

<mosaic_0001>
module attributes {stable_mosaic.version = 11 : i64} {
  func.func @kernel(%arg0: i32, %arg1: memref<8x16x16xf32, #tpu.memory_space<vmem>>, %arg2: memref<24x16xf32, #tpu.memory_space<vmem>>, %arg3: memref<16x128xf32, #tpu.memory_space<vmem>>, %arg4: memref<8x24x128xf32, #tpu.memory_space<vmem>>, %arg5: memref<8x24x16xf32, #tpu.memory_space<vmem>>) attributes {dimension_semantics = [#tpu.dimension_semantics<parallel>], iteration_bounds = array<i64: 1>, scalar_prefetch = 0 : i64, scratch_operands = 1 : i64, tpu.core_type = #tpu.core_type<tc>, window_params = [{transform_indices = @transform_0, window_bounds = array<i64: 8, 16, 16>}, {pipeline_mode = #tpu.pipeline_mode<synchronous>, transform_indices = @transform_1, window_bounds = array<i64: 24, 16>}, {pipeline_mode = #tpu.pipeline_mode<synchronous>, transform_indices = @transform_2, window_bounds = array<i64: 16, 128>}, {transform_indices = @transform_3, window_bounds = array<i64: 8, 24, 128>}]} {
    %c0 = arith.constant 0 : index
    %c0_0 = arith.constant 0 : index
    %0 = vector.load %arg2[%c0, %c0_0] : memref<24x16xf32, #tpu.memory_space<vmem>>, vector<24x16xf32>
    %c0_1 = arith.constant 0 : index
    %c0_2 = arith.constant 0 : index
    %1 = vector.load %arg3[%c0_1, %c0_2] : memref<16x128xf32, #tpu.memory_space<vmem>>, vector<16x128xf32>
    %c0_i32 = arith.constant 0 : i32
    %2 = arith.index_cast %c0_i32 : i32 to index
    %c0_3 = arith.constant 0 : index
    %c0_4 = arith.constant 0 : index
    %3 = vector.load %arg1[%2, %c0_3, %c0_4] : memref<8x16x16xf32, #tpu.memory_space<vmem>>, vector<1x16x16xf32>
    %4 = vector.shape_cast %3 : vector<1x16x16xf32> to vector<16x16xf32>
    %cst = arith.constant dense<0.000000e+00> : vector<24x16xf32>
    %5 = tpu.matmul %0, %4, %cst {dimension_numbers = #tpu.dot_dimension_numbers<[1], [0], [0], [1], [0, 0, 1, 1], [], []>} : vector<24x16xf32>, vector<16x16xf32>, vector<24x16xf32> -> vector<24x16xf32>
    %6 = arith.index_cast %c0_i32 : i32 to index
    %c0_5 = arith.constant 0 : index
    %c0_6 = arith.constant 0 : index
    %7 = vector.load %arg5[%6, %c0_5, %c0_6] : memref<8x24x16xf32, #tpu.memory_space<vmem>>, vector<1x24x16xf32>
    %8 = vector.shape_cast %7 : vector<1x24x16xf32> to vector<24x16xf32>
    %9 = vector.shape_cast %5 : vector<24x16xf32> to vector<1x24x16xf32>
    tpu.vector_store %arg5[%6, %c0_5, %c0_6], %9 {strides = array<i32>} : memref<8x24x16xf32, #tpu.memory_space<vmem>>, vector<1x24x16xf32>,
    %c1_i32 = arith.constant 1 : i32
    %10 = arith.index_cast %c1_i32 : i32 to index
    %c0_7 = arith.constant 0 : index
    %c0_8 = arith.constant 0 : index
    %11 = vector.load %arg1[%10, %c0_7, %c0_8] : memref<8x16x16xf32, #tpu.memory_space<vmem>>, vector<1x16x16xf32>
    %12 = vector.shape_cast %11 : vector<1x16x16xf32> to vector<16x16xf32>
    %cst_9 = arith.constant dense<0.000000e+00> : vector<24x16xf32>
    %13 = tpu.matmul %0, %12, %cst_9 {dimension_numbers = #tpu.dot_dimension_numbers<[1], [0], [0], [1], [0, 0, 1, 1], [], []>} : vector<24x16xf32>, vector<16x16xf32>, vector<24x16xf32> -> vector<24x16xf32>
    %14 = arith.index_cast %c1_i32 : i32 to index
    %c0_10 = arith.constant 0 : index
    %c0_11 = arith.constant 0 : index
    %15 = vector.load %arg5[%14, %c0_10, %c0_11] : memref<8x24x16xf32, #tpu.memory_space<vmem>>, vector<1x24x16xf32>
    %16 = vector.shape_cast %15 : vector<1x24x16xf32> to vector<24x16xf32>
    %17 = vector.shape_cast %13 : vector<24x16xf32> to vector<1x24x16xf32>
    tpu.vector_store %arg5[%14, %c0_10, %c0_11], %17 {strides = array<i32>} : memref<8x24x16xf32, #tpu.memory_space<vmem>>, vector<1x24x16xf32>,
    %c2_i32 = arith.constant 2 : i32
    %18 = arith.index_cast %c2_i32 : i32 to index
    %c0_12 = arith.constant 0 : index
    %c0_13 = arith.constant 0 : index
    %19 = vector.load %arg1[%18, %c0_12, %c0_13] : memref<8x16x16xf32, #tpu.memory_space<vmem>>, vector<1x16x16xf32>
    %20 = vector.shape_cast %19 : vector<1x16x16xf32> to vector<16x16xf32>
    %cst_14 = arith.constant dense<0.000000e+00> : vector<24x16xf32>
    %21 = tpu.matmul %0, %20, %cst_14 {dimension_numbers = #tpu.dot_dimension_numbers<[1], [0], [0], [1], [0, 0, 1, 1], [], []>} : vector<24x16xf32>, vector<16x16xf32>, vector<24x16xf32> -> vector<24x16xf32>
    %22 = arith.index_cast %c2_i32 : i32 to index
    %c0_15 = arith.constant 0 : index
    %c0_16 = arith.constant 0 : index
    %23 = vector.load %arg5[%22, %c0_15, %c0_16] : memref<8x24x16xf32, #tpu.memory_space<vmem>>, vector<1x24x16xf32>
    %24 = vector.shape_cast %23 : vector<1x24x16xf32> to vector<24x16xf32>
    %25 = vector.shape_cast %21 : vector<24x16xf32> to vector<1x24x16xf32>
    tpu.vector_store %arg5[%22, %c0_15, %c0_16], %25 {strides = array<i32>} : memref<8x24x16xf32, #tpu.memory_space<vmem>>, vector<1x24x16xf32>,
    %c3_i32 = arith.constant 3 : i32
    %26 = arith.index_cast %c3_i32 : i32 to index
    %c0_17 = arith.constant 0 : index
    %c0_18 = arith.constant 0 : index
    %27 = vector.load %arg1[%26, %c0_17, %c0_18] : memref<8x16x16xf32, #tpu.memory_space<vmem>>, vector<1x16x16xf32>
    %28 = vector.shape_cast %27 : vector<1x16x16xf32> to vector<16x16xf32>
    %cst_19 = arith.constant dense<0.000000e+00> : vector<24x16xf32>
    %29 = tpu.matmul %0, %28, %cst_19 {dimension_numbers = #tpu.dot_dimension_numbers<[1], [0], [0], [1], [0, 0, 1, 1], [], []>} : vector<24x16xf32>, vector<16x16xf32>, vector<24x16xf32> -> vector<24x16xf32>
    %30 = arith.index_cast %c3_i32 : i32 to index
    %c0_20 = arith.constant 0 : index
    %c0_21 = arith.constant 0 : index
    %31 = vector.load %arg5[%30, %c0_20, %c0_21] : memref<8x24x16xf32, #tpu.memory_space<vmem>>, vector<1x24x16xf32>
    %32 = vector.shape_cast %31 : vector<1x24x16xf32> to vector<24x16xf32>
    %33 = vector.shape_cast %29 : vector<24x16xf32> to vector<1x24x16xf32>
    tpu.vector_store %arg5[%30, %c0_20, %c0_21], %33 {strides = array<i32>} : memref<8x24x16xf32, #tpu.memory_space<vmem>>, vector<1x24x16xf32>,
    %c4_i32 = arith.constant 4 : i32
    %34 = arith.index_cast %c4_i32 : i32 to index
    %c0_22 = arith.constant 0 : index
    %c0_23 = arith.constant 0 : index
    %35 = vector.load %arg1[%34, %c0_22, %c0_23] : memref<8x16x16xf32, #tpu.memory_space<vmem>>, vector<1x16x16xf32>
    %36 = vector.shape_cast %35 : vector<1x16x16xf32> to vector<16x16xf32>
    %cst_24 = arith.constant dense<0.000000e+00> : vector<24x16xf32>
    %37 = tpu.matmul %0, %36, %cst_24 {dimension_numbers = #tpu.dot_dimension_numbers<[1], [0], [0], [1], [0, 0, 1, 1], [], []>} : vector<24x16xf32>, vector<16x16xf32>, vector<24x16xf32> -> vector<24x16xf32>
    %38 = arith.index_cast %c4_i32 : i32 to index
    %c0_25 = arith.constant 0 : index
    %c0_26 = arith.constant 0 : index
    %39 = vector.load %arg5[%38, %c0_25, %c0_26] : memref<8x24x16xf32, #tpu.memory_space<vmem>>, vector<1x24x16xf32>
    %40 = vector.shape_cast %39 : vector<1x24x16xf32> to vector<24x16xf32>
    %41 = vector.shape_cast %37 : vector<24x16xf32> to vector<1x24x16xf32>
    tpu.vector_store %arg5[%38, %c0_25, %c0_26], %41 {strides = array<i32>} : memref<8x24x16xf32, #tpu.memory_space<vmem>>, vector<1x24x16xf32>,
    %c5_i32 = arith.constant 5 : i32
    %42 = arith.index_cast %c5_i32 : i32 to index
    %c0_27 = arith.constant 0 : index
    %c0_28 = arith.constant 0 : index
    %43 = vector.load %arg1[%42, %c0_27, %c0_28] : memref<8x16x16xf32, #tpu.memory_space<vmem>>, vector<1x16x16xf32>
    %44 = vector.shape_cast %43 : vector<1x16x16xf32> to vector<16x16xf32>
    %cst_29 = arith.constant dense<0.000000e+00> : vector<24x16xf32>
    %45 = tpu.matmul %0, %44, %cst_29 {dimension_numbers = #tpu.dot_dimension_numbers<[1], [0], [0], [1], [0, 0, 1, 1], [], []>} : vector<24x16xf32>, vector<16x16xf32>, vector<24x16xf32> -> vector<24x16xf32>
    %46 = arith.index_cast %c5_i32 : i32 to index
    %c0_30 = arith.constant 0 : index
    %c0_31 = arith.constant 0 : index
    %47 = vector.load %arg5[%46, %c0_30, %c0_31] : memref<8x24x16xf32, #tpu.memory_space<vmem>>, vector<1x24x16xf32>
    %48 = vector.shape_cast %47 : vector<1x24x16xf32> to vector<24x16xf32>
    %49 = vector.shape_cast %45 : vector<24x16xf32> to vector<1x24x16xf32>
    tpu.vector_store %arg5[%46, %c0_30, %c0_31], %49 {strides = array<i32>} : memref<8x24x16xf32, #tpu.memory_space<vmem>>, vector<1x24x16xf32>,
    %c6_i32 = arith.constant 6 : i32
    %50 = arith.index_cast %c6_i32 : i32 to index
    %c0_32 = arith.constant 0 : index
    %c0_33 = arith.constant 0 : index
    %51 = vector.load %arg1[%50, %c0_32, %c0_33] : memref<8x16x16xf32, #tpu.memory_space<vmem>>, vector<1x16x16xf32>
    %52 = vector.shape_cast %51 : vector<1x16x16xf32> to vector<16x16xf32>
    %cst_34 = arith.constant dense<0.000000e+00> : vector<24x16xf32>
    %53 = tpu.matmul %0, %52, %cst_34 {dimension_numbers = #tpu.dot_dimension_numbers<[1], [0], [0], [1], [0, 0, 1, 1], [], []>} : vector<24x16xf32>, vector<16x16xf32>, vector<24x16xf32> -> vector<24x16xf32>
    %54 = arith.index_cast %c6_i32 : i32 to index
    %c0_35 = arith.constant 0 : index
    %c0_36 = arith.constant 0 : index
    %55 = vector.load %arg5[%54, %c0_35, %c0_36] : memref<8x24x16xf32, #tpu.memory_space<vmem>>, vector<1x24x16xf32>
    %56 = vector.shape_cast %55 : vector<1x24x16xf32> to vector<24x16xf32>
    %57 = vector.shape_cast %53 : vector<24x16xf32> to vector<1x24x16xf32>
    tpu.vector_store %arg5[%54, %c0_35, %c0_36], %57 {strides = array<i32>} : memref<8x24x16xf32, #tpu.memory_space<vmem>>, vector<1x24x16xf32>,
    %c7_i32 = arith.constant 7 : i32
    %58 = arith.index_cast %c7_i32 : i32 to index
    %c0_37 = arith.constant 0 : index
    %c0_38 = arith.constant 0 : index
    %59 = vector.load %arg1[%58, %c0_37, %c0_38] : memref<8x16x16xf32, #tpu.memory_space<vmem>>, vector<1x16x16xf32>
    %60 = vector.shape_cast %59 : vector<1x16x16xf32> to vector<16x16xf32>
    %cst_39 = arith.constant dense<0.000000e+00> : vector<24x16xf32>
    %61 = tpu.matmul %0, %60, %cst_39 {dimension_numbers = #tpu.dot_dimension_numbers<[1], [0], [0], [1], [0, 0, 1, 1], [], []>} : vector<24x16xf32>, vector<16x16xf32>, vector<24x16xf32> -> vector<24x16xf32>
    %62 = arith.index_cast %c7_i32 : i32 to index
    %c0_40 = arith.constant 0 : index
    %c0_41 = arith.constant 0 : index
    %63 = vector.load %arg5[%62, %c0_40, %c0_41] : memref<8x24x16xf32, #tpu.memory_space<vmem>>, vector<1x24x16xf32>
    %64 = vector.shape_cast %63 : vector<1x24x16xf32> to vector<24x16xf32>
    %65 = vector.shape_cast %61 : vector<24x16xf32> to vector<1x24x16xf32>
    tpu.vector_store %arg5[%62, %c0_40, %c0_41], %65 {strides = array<i32>} : memref<8x24x16xf32, #tpu.memory_space<vmem>>, vector<1x24x16xf32>,
    %c8_i32 = arith.constant 8 : i32
    %c0_42 = arith.constant 0 : index
    %c0_43 = arith.constant 0 : index
    %c0_44 = arith.constant 0 : index
    %66 = vector.load %arg5[%c0_42, %c0_43, %c0_44] : memref<8x24x16xf32, #tpu.memory_space<vmem>>, vector<8x24x16xf32>
    %67 = vector.shape_cast %66 : vector<8x24x16xf32> to vector<192x16xf32>
    %cst_45 = arith.constant dense<0.000000e+00> : vector<192x128xf32>
    %68 = tpu.matmul %67, %1, %cst_45 {dimension_numbers = #tpu.dot_dimension_numbers<[1], [0], [0], [1], [0, 0, 1, 1], [], []>} : vector<192x16xf32>, vector<16x128xf32>, vector<192x128xf32> -> vector<192x128xf32>
    %69 = vector.shape_cast %68 : vector<192x128xf32> to vector<8x24x128xf32>
    %c0_46 = arith.constant 0 : index
    %c0_47 = arith.constant 0 : index
    %c0_48 = arith.constant 0 : index
    %70 = vector.load %arg4[%c0_46, %c0_47, %c0_48] : memref<8x24x128xf32, #tpu.memory_space<vmem>>, vector<8x24x128xf32>
    tpu.vector_store %arg4[%c0_46, %c0_47, %c0_48], %69 {strides = array<i32>} : memref<8x24x128xf32, #tpu.memory_space<vmem>>, vector<8x24x128xf32>,
    return
  }
  func.func @transform_0(%arg0: i32) -> (i32, i32, i32) {
    %c0_i32 = arith.constant 0 : i32
    %c0_i32_0 = arith.constant 0 : i32
    %c0_i32_1 = arith.constant 0 : i32
    return %arg0, %c0_i32, %c0_i32_0 : i32, i32, i32
  }
  func.func @transform_1(%arg0: i32) -> (i32, i32) {
    %c0_i32 = arith.constant 0 : i32
    %c0_i32_0 = arith.constant 0 : i32
    %c0_i32_1 = arith.constant 0 : i32
    return %c0_i32, %c0_i32_0 : i32, i32
  }
  func.func @transform_2(%arg0: i32) -> (i32, i32) {
    %c0_i32 = arith.constant 0 : i32
    %c0_i32_0 = arith.constant 0 : i32
    %c0_i32_1 = arith.constant 0 : i32
    return %c0_i32, %c0_i32_0 : i32, i32
  }
  func.func @transform_3(%arg0: i32) -> (i32, i32, i32) {
    %c0_i32 = arith.constant 0 : i32
    %c0_i32_0 = arith.constant 0 : i32
    %c0_i32_1 = arith.constant 0 : i32
    return %arg0, %c0_i32, %c0_i32_0 : i32, i32, i32
  }
}

</mosaic_0001>

<bundles_post_ra>
// kernel: tpu_custom_call.1
= control target key start
LH: loop header
LB: loop body
LE: loop exit
PB: predicated region body
PF: predicated region fallthrough
CT: control target
= control target key end

     0   :  { %8 = vsyncpa [#allocation4], 0  ;;  %s1615_s0 = inlined_call_operand.hbm [shape: f32[8,16,16], index: 0, kind: input, shape index: {}]   ;;  %s1616_s1 = inlined_call_operand.vmem [shape: f32[24,16], index: 1, kind: input, shape index: {}]   ;;  %s1617_s2 = inlined_call_operand.vmem [shape: f32[16,128], index: 2, kind: input, shape index: {}]   ;;  %s1618_s3 = inlined_call_operand.hbm [shape: f32[8,24,128], index: 3, kind: output, shape index: {}]  }
   0x1   :  { %9 = vsyncpa [#allocation5], 0  ;;  %s1403_s12 = smov [#allocation3]   ;;  %s1355_s16 = scalar_lea.hbm %s1615_s0, 2048 }
   0x2   :  { %s15_s13 = sshll.u32 %s1403_s12, 4  ;;  %p1356_p0 = scmp.ne.s32.totalorder %s1615_s0, %s1355_s16  ;;  %s16_s13 = int_to_ptr.vmem [resolvable:$true] %s15_s13 }
   0x3   :  { %p1359_p1 = scmp.lt.u32.totalorder %s1355_s16, %s1615_s0 }
   0x5   :  { %p1361_p2 = pnand %p1359_p1, %p1356_p0 }
   0x7   :  { %1364 = shalt.err (!%p1361_p2)
}
   0x8   :  { %s1365_s21 = scalar_lea.vmem %s16_s13, 2048  ;;  %p1370_p4 = scmp.lt.s32.totalorder %s16_s13, %s16_s13 }
   0x9   :  { %p1366_p3 = scmp.ne.s32.totalorder %s16_s13, %s1365_s21  ;;  %p1371_p5 = scmp.lt.s32.totalorder %s1365_s21, %s1365_s21 }
   0xb   :  { %p1372_p6 = por %p1371_p5, %p1370_p4 }
   0xd   :  { %p1373_p7 = pnand %p1372_p6, %p1366_p3 }
   0xf   :  { %1376 = shalt.err (!%p1373_p7)
}
  0x10   :  { %s1404_s22 = smov 128   ;;  %s1405_s23 = smov 8  }
  0x11   :  { %21 = dma.hbm_to_vmem [thread:$0]  %s1615_s0, 2048, %s16_s13, [#allocation4], %s1404_s22, %s1404_s22, %s1405_s23  }
  0x12   :  { %1399 = dma.done.wait [#allocation4], 2048  }
  0x13   :  { %1400 = vsyncadd [#allocation4], 4294965248  ;;  %v1406_v0 = vmov 0.0|0.0   ;;  %vm1407_vm0 = vmmov 0   ;;  %v1408_v1 = vmov 0.0   ;;  %v34_v2 = vld [vmem:[#allocation3] sm:$0xff] }
  0x14   :  { %1318 = vmatprep.subr.bf16.mxu0 %v1406_v0  ;;  %1178 = vmatprep.mubr.msk.f32.mxu0 %vm1407_vm0, %v1408_v1  ;;  %v35_v3 = vld [vmem:[#allocation3 + $0x8] sm:$0xff]  ;;  %v217_v5 = vld [vmem:[#allocation3 + $0x20] sm:$0xff]  ;;  %v130_v7 = vld [vmem:[#allocation3 + $0x10] sm:$0xff]  ;;  %vm36_vm1 = vcmask 130048  }
  0x15   :  { %1321 = vmatprep.subr.bf16.mxu1 %v1406_v0  ;;  %1191 = vmatprep.mubr.msk.f32.mxu1 %vm1407_vm0, %v1408_v1  ;;  %v1319_v4 = vpack.c.bf16 %v35_v3, %v34_v2  ;;  %v218_v6 = vld [vmem:[#allocation3 + $0x28] sm:$0xff]  ;;  %v131_v8 = vld [vmem:[#allocation3 + $0x18] sm:$0xff]  ;;  %v304_v9 = vld [vmem:[#allocation3 + $0x30] sm:$0xff] }
  0x16   :  { %v1452_v10 = vld [vmem:[%s1616_s1] sm:$0xff]  ;;  %v1325_v11 = vpack.c.bf16 %v218_v6, %v217_v5  ;;  %v1322_v12 = vpack.c.bf16 %v131_v8, %v130_v7  ;;  %v305_v13 = vld [vmem:[#allocation3 + $0x38] sm:$0xff]  ;;  %v1461_v15 = vld [vmem:[%s1616_s1 + $0x8] sm:$0xff] }
  0x17   :  { %1320 = vmatpush3.bf16.msra.mxu0 %v1319_v4  ;;  %v1328_v14 = vpack.c.bf16 %v305_v13, %v304_v9  ;;  %v31_v16 = vld [vmem:[%s1616_s1 + $0x10] sm:$0xff]  ;;  %v391_v17 = vld [vmem:[#allocation3 + $0x40] sm:$0xff]  ;;  %v392_v18 = vld [vmem:[#allocation3 + $0x48] sm:$0xff] }
  0x18   :  { %1324 = vmatprep.subr.bf16.mxu0 %v1406_v0  ;;  %1323 = vmatpush3.bf16.msra.mxu1 %v1322_v12  ;;  %v478_v19 = vld [vmem:[#allocation3 + $0x50] sm:$0xff]  ;;  %v479_v20 = vld [vmem:[#allocation3 + $0x58] sm:$0xff]  ;;  %v1331_v21 = vpack.c.bf16 %v392_v18, %v391_v17  ;;  %v565_v23 = vld [vmem:[#allocation3 + $0x60] sm:$0xff] }
  0x19   :  { %1327 = vmatprep.subr.bf16.mxu1 %v1406_v0  ;;  %v1334_v22 = vpack.c.bf16 %v479_v20, %v478_v19  ;;  %v566_v24 = vld [vmem:[#allocation3 + $0x68] sm:$0xff]  ;;  %v652_v25 = vld [vmem:[#allocation3 + $0x70] sm:$0xff]  ;;  %v653_v26 = vld [vmem:[#allocation3 + $0x78] sm:$0xff] }
  0x1a   :  { %1179 = vmatmul.mubr.msk.f32.vlgmr.msra.gmra.mrb[0].mxu0 %vm36_vm1, %v1452_v10  ;;  %v1337_v27 = vpack.c.bf16 %v566_v24, %v565_v23  ;;  %v1340_v28 = vpack.c.bf16 %v653_v26, %v652_v25  ;;  %v32_v29 = vld [vmem:[%s1617_s2] sm:$0xff]  ;;  %v33_v30 = vld [vmem:[%s1617_s2 + $0x8] sm:$0xff]  ;;  %s1409_s2 = smov [#allocation6]  }
  0x1b   :  { %1326 = vmatpush3.bf16.msra.mxu0 %v1325_v11  ;;  %1181 = vmatprep.mubr.msk.f32.mxu0 %vm1407_vm0, %v1408_v1  ;;  %v1342_v31 = vpack.c.bf16 %v33_v30, %v32_v29  ;;  %s1048_s7 = sshll.u32 %s1409_s2, 4  ;;  %s1049_s7 = int_to_ptr.vmem [resolvable:$true] %s1048_s7 }
  0x1c   :  { %1192 = vmatmul.mubr.msk.f32.vlgmr.msra.gmra.mrb[0].mxu1 %vm36_vm1, %v1452_v10  ;;  %1330 = vmatprep.subr.bf16.mxu0 %v1406_v0  ;;  %s1377_s8 = scalar_lea.vmem %s1049_s7, 3072  ;;  %p1382_p9 = scmp.lt.s32.totalorder %s1049_s7, %s1049_s7 }
  0x1d   :  { %1329 = vmatpush3.bf16.msra.mxu1 %v1328_v14  ;;  %1194 = vmatprep.mubr.msk.f32.mxu1 %vm1407_vm0, %v1408_v1  ;;  %p1378_p8 = scmp.ne.s32.totalorder %s1049_s7, %s1377_s8  ;;  %p1383_p10 = scmp.lt.s32.totalorder %s1377_s8, %s1377_s8 }
  0x1e   :  { %1182 = vmatmul.mubr.msk.f32.gmra.mrb[2].mxu0 %vm36_vm1, %v1461_v15  ;;  %1333 = vmatprep.subr.bf16.mxu1 %v1406_v0 }
  0x1f   :  { %1184 = vmatprep.mubr.msk.f32.mxu0 %vm1407_vm0, %v1408_v1  ;;  %p1384_p11 = por %p1383_p10, %p1382_p9 }
  0x20   :  { %1195 = vmatmul.mubr.msk.f32.gmra.mrb[2].mxu1 %vm36_vm1, %v1461_v15 }
  0x21   :  { %1197 = vmatprep.mubr.msk.f32.mxu1 %vm1407_vm0, %v1408_v1  ;;  %p1385_p12 = pnand %p1384_p11, %p1378_p8 }
  0x22   :  { %1185 = vmatmul.mubr.msk.f32.gmra.mrb[4].mxu0 %vm36_vm1, %v31_v16 }
  0x23   :  { %1204 = vmatprep.mubr.msk.f32.mxu0 %vm1407_vm0, %v1408_v1 }
  0x24   :  { %1198 = vmatmul.mubr.msk.f32.gmra.mrb[4].mxu1 %vm36_vm1, %v31_v16 }
  0x25   :  { %1217 = vmatprep.mubr.msk.f32.mxu1 %vm1407_vm0, %v1408_v1 }
  0x26   :  { %1205 = vmatmul.mubr.msk.f32.vlgmr.msra.gmra.mrb[6].mxu0 %vm36_vm1, %v1452_v10 }
  0x27   :  { %1332 = vmatpush3.bf16.msra.mxu0 %v1331_v21  ;;  %1207 = vmatprep.mubr.msk.f32.mxu0 %vm1407_vm0, %v1408_v1 }
  0x28   :  { %1218 = vmatmul.mubr.msk.f32.vlgmr.msra.gmra.mrb[6].mxu1 %vm36_vm1, %v1452_v10  ;;  %1336 = vmatprep.subr.bf16.mxu0 %v1406_v0 }
  0x29   :  { %1335 = vmatpush3.bf16.msra.mxu1 %v1334_v22  ;;  %1220 = vmatprep.mubr.msk.f32.mxu1 %vm1407_vm0, %v1408_v1 }
  0x2a   :  { %1208 = vmatmul.mubr.msk.f32.gmra.mrb[8].mxu0 %vm36_vm1, %v1461_v15  ;;  %1339 = vmatprep.subr.bf16.mxu1 %v1406_v0 }
  0x2b   :  { %1210 = vmatprep.mubr.msk.f32.mxu0 %vm1407_vm0, %v1408_v1 }
  0x2c   :  { %1221 = vmatmul.mubr.msk.f32.gmra.mrb[8].mxu1 %vm36_vm1, %v1461_v15 }
  0x2d   :  { %1223 = vmatprep.mubr.msk.f32.mxu1 %vm1407_vm0, %v1408_v1 }
  0x2e   :  { %1211 = vmatmul.mubr.msk.f32.gmra.mrb[10].mxu0 %vm36_vm1, %v31_v16 }
  0x2f   :  { %1230 = vmatprep.mubr.msk.f32.mxu0 %vm1407_vm0, %v1408_v1 }
  0x30   :  { %1224 = vmatmul.mubr.msk.f32.gmra.mrb[10].mxu1 %vm36_vm1, %v31_v16 }
  0x31   :  { %1243 = vmatprep.mubr.msk.f32.mxu1 %vm1407_vm0, %v1408_v1 }
  0x32   :  { %1231 = vmatmul.mubr.msk.f32.vlgmr.msra.gmra.mrb[12].mxu0 %vm36_vm1, %v1452_v10 }
  0x33   :  { %1338 = vmatpush3.bf16.msra.mxu0 %v1337_v27  ;;  %1233 = vmatprep.mubr.msk.f32.mxu0 %vm1407_vm0, %v1408_v1 }
  0x34   :  { %1244 = vmatmul.mubr.msk.f32.vlgmr.msra.gmra.mrb[12].mxu1 %vm36_vm1, %v1452_v10  ;;  %1343 = vmatprep.subr.bf16.mxu0 %v1342_v31 }
  0x35   :  { %1341 = vmatpush3.bf16.msra.mxu1 %v1340_v28  ;;  %1246 = vmatprep.mubr.msk.f32.mxu1 %vm1407_vm0, %v1408_v1 }
  0x36   :  { %1234 = vmatmul.mubr.msk.f32.gmra.mrb[14].mxu0 %vm36_vm1, %v1461_v15  ;;  %1346 = vmatprep.subr.bf16.mxu1 %v1342_v31 }
  0x37   :  { %1236 = vmatprep.mubr.msk.f32.mxu0 %vm1407_vm0, %v1408_v1 }
  0x38   :  { %1247 = vmatmul.mubr.msk.f32.gmra.mrb[14].mxu1 %vm36_vm1, %v1461_v15 }
  0x39   :  { %1249 = vmatprep.mubr.msk.f32.mxu1 %vm1407_vm0, %v1408_v1 }
  0x3a   :  { %1237 = vmatmul.mubr.msk.f32.gmra.mrb[16].mxu0 %vm36_vm1, %v31_v16 }
  0x3b   :  { %1256 = vmatprep.mubr.msk.f32.mxu0 %vm1407_vm0, %v1408_v1 }
  0x3c   :  { %1250 = vmatmul.mubr.msk.f32.gmra.mrb[16].mxu1 %vm36_vm1, %v31_v16 }
  0x3d   :  { %1269 = vmatprep.mubr.msk.f32.mxu1 %vm1407_vm0, %v1408_v1 }
  0x3e   :  { %1257 = vmatmul.mubr.msk.f32.vlgmr.msra.gmra.mrb[18].mxu0 %vm36_vm1, %v1452_v10 }
  0x3f   :  { %1259 = vmatprep.mubr.msk.f32.mxu0 %vm1407_vm0, %v1408_v1  ;;  %1345 = vmatpush3.bf16.msra.mxu0 %v1342_v31 }
  0x40   :  { %1270 = vmatmul.mubr.msk.f32.vlgmr.msra.gmra.mrb[18].mxu1 %vm36_vm1, %v1452_v10 }
  0x41   :  { %1272 = vmatprep.mubr.msk.f32.mxu1 %vm1407_vm0, %v1408_v1  ;;  %1347 = vmatpush3.bf16.msra.mxu1 %v1342_v31 }
  0x42   :  { %1260 = vmatmul.mubr.msk.f32.gmra.mrb[20].mxu0 %vm36_vm1, %v1461_v15 }
  0x43   :  { %1262 = vmatprep.mubr.msk.f32.mxu0 %vm1407_vm0, %v1408_v1 }
  0x44   :  { %1273 = vmatmul.mubr.msk.f32.gmra.mrb[20].mxu1 %vm36_vm1, %v1461_v15 }
  0x45   :  { %1275 = vmatprep.mubr.msk.f32.mxu1 %vm1407_vm0, %v1408_v1 }
  0x46   :  { %1263 = vmatmul.mubr.msk.f32.gmra.mrb[22].mxu0 %vm36_vm1, %v31_v16 }
  0x48   :  { %1276 = vmatmul.mubr.msk.f32.gmra.mrb[22].mxu1 %vm36_vm1, %v31_v16 }
  0xed   :  { %v112_v32 = vpop.f32.mrb[0].mxu0 }
  0xee   :  { %126 = vst.msk [vmem:[#allocation2] sm:$0xff] %vm36_vm1, %v112_v32  ;;  %v1180_v33 = vpop.f32.mrb[1].mxu0 }
  0xef   :  { %v198_v34 = vpop.f32.mrb[0].mxu1 }
  0xf0   :  { %213 = vst.msk [vmem:[#allocation2 + $0x18] sm:$0xff] %vm36_vm1, %v198_v34  ;;  %v1193_v35 = vpop.f32.mrb[1].mxu1 }
  0xf1   :  { %v117_v36 = vpop.f32.mrb[2].mxu0 }
  0xf2   :  { %127 = vst.msk [vmem:[#allocation2 + $0x8] sm:$0xff] %vm36_vm1, %v117_v36  ;;  %v1183_v37 = vpop.f32.mrb[3].mxu0 }
  0xf3   :  { %v203_v38 = vpop.f32.mrb[2].mxu1 }
  0xf4   :  { %214 = vst.msk [vmem:[#allocation2 + $0x20] sm:$0xff] %vm36_vm1, %v203_v38  ;;  %v1196_v39 = vpop.f32.mrb[3].mxu1 }
  0xf5   :  { %v122_v40 = vpop.f32.mrb[4].mxu0  ;;  %v738_v41 = vld [vmem:[#allocation2] sm:$0xff] }
  0xf6   :  { %128 = vst.msk [vmem:[#allocation2 + $0x10] sm:$0xff] %vm36_vm1, %v122_v40  ;;  %v1186_v42 = vpop.f32.mrb[5].mxu0  ;;  %1282 = vmatprep.mubr.msk.f32.mxu0 %vm36_vm1, %v738_v41 }
  0xf7   :  { %v208_v43 = vpop.f32.mrb[4].mxu1  ;;  %v741_v54 = vld [vmem:[#allocation2 + $0x18] sm:$0xff] }
  0xf8   :  { %215 = vst.msk [vmem:[#allocation2 + $0x28] sm:$0xff] %vm36_vm1, %v208_v43  ;;  %v1199_v44 = vpop.f32.mrb[5].mxu1 }
  0xf9   :  { %v285_v45 = vpop.f32.mrb[6].mxu0  ;;  %v739_v46 = vld [vmem:[#allocation2 + $0x8] sm:$0xff] }
  0xfa   :  { %300 = vst.msk [vmem:[#allocation2 + $0x30] sm:$0xff] %vm36_vm1, %v285_v45  ;;  %v1206_v47 = vpop.f32.mrb[7].mxu0  ;;  %1283 = vmatmul.mubr.msk.f32.vlgmr.msra.gmra.mrb[24].mxu0 %vm36_vm1, %v739_v46 }
  0xfb   :  { %v372_v48 = vpop.f32.mrb[6].mxu1  ;;  %v742_v52 = vld [vmem:[#allocation2 + $0x20] sm:$0xff] }
  0xfc   :  { %387 = vst.msk [vmem:[#allocation2 + $0x48] sm:$0xff] %vm36_vm1, %v372_v48  ;;  %v1219_v49 = vpop.f32.mrb[7].mxu1 }
  0xfd   :  { %v290_v50 = vpop.f32.mrb[8].mxu0  ;;  %v740_v51 = vld [vmem:[#allocation2 + $0x10] sm:$0xff] }
  0xfe   :  { %301 = vst.msk [vmem:[#allocation2 + $0x38] sm:$0xff] %vm36_vm1, %v290_v50  ;;  %v1209_v53 = vpop.f32.mrb[9].mxu0  ;;  %1285 = vmatprep.mubr.msk.f32.mxu0 %vm36_vm1, %v740_v51 }
  0xff   :  { %1286 = vmatmul.mubr.msk.f32.gmra.mrb[26].mxu0 %vm36_vm1, %v741_v54  ;;  %v377_v55 = vpop.f32.mrb[8].mxu1  ;;  %v743_v57 = vld [vmem:[#allocation2 + $0x28] sm:$0xff] }
 0x100   :  { %1288 = vmatprep.mubr.msk.f32.mxu0 %vm36_vm1, %v742_v52  ;;  %388 = vst.msk [vmem:[#allocation2 + $0x50] sm:$0xff] %vm36_vm1, %v377_v55  ;;  %v1222_v56 = vpop.f32.mrb[9].mxu1 }
 0x101   :  { %v295_v58 = vpop.f32.mrb[10].mxu0  ;;  %v744_v60 = vld [vmem:[#allocation2 + $0x30] sm:$0xff] }
 0x102   :  { %302 = vst.msk [vmem:[#allocation2 + $0x40] sm:$0xff] %vm36_vm1, %v295_v58  ;;  %v1212_v59 = vpop.f32.mrb[11].mxu0 }
 0x103   :  { %1289 = vmatmul.mubr.msk.f32.gmra.mrb[28].mxu0 %vm36_vm1, %v743_v57  ;;  %v382_v61 = vpop.f32.mrb[10].mxu1  ;;  %v747_v8 = vld [vmem:[#allocation2 + $0x48] sm:$0xff] }
 0x104   :  { %1291 = vmatprep.mubr.msk.f32.mxu0 %vm36_vm1, %v744_v60  ;;  %389 = vst.msk [vmem:[#allocation2 + $0x58] sm:$0xff] %vm36_vm1, %v382_v61  ;;  %v1225_v62 = vpop.f32.mrb[11].mxu1 }
 0x105   :  { %v459_v63 = vpop.f32.mrb[12].mxu0  ;;  %v745_v0 = vld [vmem:[#allocation2 + $0x38] sm:$0xff] }
 0x106   :  { %474 = vst.msk [vmem:[#allocation2 + $0x60] sm:$0xff] %vm36_vm1, %v459_v63  ;;  %v1232_v1 = vpop.f32.mrb[13].mxu0 }
 0x107   :  { %1292 = vmatmul.mubr.msk.f32.gmra.mrb[30].mxu0 %vm36_vm1, %v745_v0  ;;  %v546_v2 = vpop.f32.mrb[12].mxu1  ;;  %v748_v6 = vld [vmem:[#allocation2 + $0x50] sm:$0xff] }
 0x108   :  { %561 = vst.msk [vmem:[#allocation2 + $0x78] sm:$0xff] %vm36_vm1, %v546_v2  ;;  %v1245_v3 = vpop.f32.mrb[13].mxu1 }
 0x109   :  { %v464_v4 = vpop.f32.mrb[14].mxu0  ;;  %v746_v5 = vld [vmem:[#allocation2 + $0x40] sm:$0xff] }
 0x10a   :  { %475 = vst.msk [vmem:[#allocation2 + $0x68] sm:$0xff] %vm36_vm1, %v464_v4  ;;  %v1235_v7 = vpop.f32.mrb[15].mxu0  ;;  %1294 = vmatprep.mubr.msk.f32.mxu0 %vm36_vm1, %v746_v5 }
 0x10b   :  { %1295 = vmatmul.mubr.msk.f32.gmra.mrb[32].mxu0 %vm36_vm1, %v747_v8  ;;  %v551_v9 = vpop.f32.mrb[14].mxu1  ;;  %v749_v11 = vld [vmem:[#allocation2 + $0x58] sm:$0xff] }
 0x10c   :  { %1297 = vmatprep.mubr.msk.f32.mxu0 %vm36_vm1, %v748_v6  ;;  %562 = vst.msk [vmem:[#allocation2 + $0x80] sm:$0xff] %vm36_vm1, %v551_v9  ;;  %v1248_v10 = vpop.f32.mrb[15].mxu1 }
 0x10d   :  { %v469_v12 = vpop.f32.mrb[16].mxu0  ;;  %v750_v13 = vld [vmem:[#allocation2 + $0x60] sm:$0xff] }
 0x10e   :  { %476 = vst.msk [vmem:[#allocation2 + $0x70] sm:$0xff] %vm36_vm1, %v469_v12  ;;  %v1238_v14 = vpop.f32.mrb[17].mxu0  ;;  %1300 = vmatprep.mubr.msk.f32.mxu1 %vm36_vm1, %v750_v13 }
 0x10f   :  { %1298 = vmatmul.mubr.msk.f32.gmra.mrb[34].mxu0 %vm36_vm1, %v749_v11  ;;  %v556_v15 = vpop.f32.mrb[16].mxu1  ;;  %v753_v26 = vld [vmem:[#allocation2 + $0x78] sm:$0xff] }
 0x110   :  { %563 = vst.msk [vmem:[#allocation2 + $0x88] sm:$0xff] %vm36_vm1, %v556_v15  ;;  %v1251_v16 = vpop.f32.mrb[17].mxu1 }
 0x111   :  { %v633_v17 = vpop.f32.mrb[18].mxu0  ;;  %v751_v18 = vld [vmem:[#allocation2 + $0x68] sm:$0xff] }
 0x112   :  { %648 = vst.msk [vmem:[#allocation2 + $0x90] sm:$0xff] %vm36_vm1, %v633_v17  ;;  %v1258_v19 = vpop.f32.mrb[19].mxu0  ;;  %1301 = vmatmul.mubr.msk.f32.vlgmr.msra.gmra.mrb[24].mxu1 %vm36_vm1, %v751_v18 }
 0x113   :  { %v720_v20 = vpop.f32.mrb[18].mxu1  ;;  %v754_v24 = vld [vmem:[#allocation2 + $0x80] sm:$0xff] }
 0x114   :  { %735 = vst.msk [vmem:[#allocation2 + $0xa8] sm:$0xff] %vm36_vm1, %v720_v20  ;;  %v1271_v21 = vpop.f32.mrb[19].mxu1 }
 0x115   :  { %v638_v22 = vpop.f32.mrb[20].mxu0  ;;  %v752_v23 = vld [vmem:[#allocation2 + $0x70] sm:$0xff] }
 0x116   :  { %649 = vst.msk [vmem:[#allocation2 + $0x98] sm:$0xff] %vm36_vm1, %v638_v22  ;;  %v1261_v25 = vpop.f32.mrb[21].mxu0  ;;  %1303 = vmatprep.mubr.msk.f32.mxu1 %vm36_vm1, %v752_v23 }
 0x117   :  { %1304 = vmatmul.mubr.msk.f32.gmra.mrb[26].mxu1 %vm36_vm1, %v753_v26  ;;  %v725_v27 = vpop.f32.mrb[20].mxu1  ;;  %v755_v29 = vld [vmem:[#allocation2 + $0x88] sm:$0xff] }
 0x118   :  { %1306 = vmatprep.mubr.msk.f32.mxu1 %vm36_vm1, %v754_v24  ;;  %736 = vst.msk [vmem:[#allocation2 + $0xb0] sm:$0xff] %vm36_vm1, %v725_v27  ;;  %v1274_v28 = vpop.f32.mrb[21].mxu1 }
 0x119   :  { %v643_v30 = vpop.f32.mrb[22].mxu0  ;;  %v756_v32 = vld [vmem:[#allocation2 + $0x90] sm:$0xff] }
 0x11a   :  { %650 = vst.msk [vmem:[#allocation2 + $0xa0] sm:$0xff] %vm36_vm1, %v643_v30  ;;  %v1264_v31 = vpop.f32.mrb[23].mxu0 }
 0x11b   :  { %1307 = vmatmul.mubr.msk.f32.gmra.mrb[28].mxu1 %vm36_vm1, %v755_v29  ;;  %v730_v33 = vpop.f32.mrb[22].mxu1  ;;  %v759_v38 = vld [vmem:[#allocation2 + $0xa8] sm:$0xff] }
 0x11c   :  { %1309 = vmatprep.mubr.msk.f32.mxu1 %vm36_vm1, %v756_v32  ;;  %737 = vst.msk [vmem:[#allocation2 + $0xb8] sm:$0xff] %vm36_vm1, %v730_v33  ;;  %v1277_v34 = vpop.f32.mrb[23].mxu1 }
 0x11d   :  { %v757_v35 = vld [vmem:[#allocation2 + $0x98] sm:$0xff] }
 0x11f   :  { %1310 = vmatmul.mubr.msk.f32.gmra.mrb[30].mxu1 %vm36_vm1, %v757_v35  ;;  %v760_v37 = vld [vmem:[#allocation2 + $0xb0] sm:$0xff] }
 0x121   :  { %v758_v36 = vld [vmem:[#allocation2 + $0xa0] sm:$0xff] }
 0x122   :  { %1312 = vmatprep.mubr.msk.f32.mxu1 %vm36_vm1, %v758_v36 }
 0x123   :  { %1313 = vmatmul.mubr.msk.f32.gmra.mrb[32].mxu1 %vm36_vm1, %v759_v38  ;;  %v761_v39 = vld [vmem:[#allocation2 + $0xb8] sm:$0xff] }
 0x124   :  { %1315 = vmatprep.mubr.msk.f32.mxu1 %vm36_vm1, %v760_v37 }
 0x127   :  { %1316 = vmatmul.mubr.msk.f32.gmra.mrb[34].mxu1 %vm36_vm1, %v761_v39 }
 0x1cd   :  { %v1284_v40 = vpop.f32.mrb[24].mxu0 }
 0x1ce   :  { %1020 = vst [vmem:[#allocation6 + $0x8] sm:$0xff] %v1284_v40  ;;  %v900_v41 = vpop.f32.mrb[25].mxu0 }
 0x1cf   :  { %1019 = vst [vmem:[#allocation6] sm:$0xff] %v900_v41 }
 0x1d2   :  { %v1287_v42 = vpop.f32.mrb[26].mxu0 }
 0x1d3   :  { %1022 = vst [vmem:[#allocation6 + $0x18] sm:$0xff] %v1287_v42  ;;  %v910_v43 = vpop.f32.mrb[27].mxu0 }
 0x1d4   :  { %1021 = vst [vmem:[#allocation6 + $0x10] sm:$0xff] %v910_v43 }
 0x1d6   :  { %v1290_v44 = vpop.f32.mrb[28].mxu0 }
 0x1d7   :  { %1024 = vst [vmem:[#allocation6 + $0x28] sm:$0xff] %v1290_v44  ;;  %v920_v45 = vpop.f32.mrb[29].mxu0 }
 0x1d8   :  { %1023 = vst [vmem:[#allocation6 + $0x20] sm:$0xff] %v920_v45 }
 0x1da   :  { %v1293_v46 = vpop.f32.mrb[30].mxu0 }
 0x1db   :  { %1026 = vst [vmem:[#allocation6 + $0x38] sm:$0xff] %v1293_v46  ;;  %v930_v47 = vpop.f32.mrb[31].mxu0 }
 0x1dc   :  { %1025 = vst [vmem:[#allocation6 + $0x30] sm:$0xff] %v930_v47 }
 0x1de   :  { %v1296_v48 = vpop.f32.mrb[32].mxu0 }
 0x1df   :  { %1028 = vst [vmem:[#allocation6 + $0x48] sm:$0xff] %v1296_v48  ;;  %v940_v49 = vpop.f32.mrb[33].mxu0 }
 0x1e0   :  { %1027 = vst [vmem:[#allocation6 + $0x40] sm:$0xff] %v940_v49 }
 0x1e2   :  { %v1299_v50 = vpop.f32.mrb[34].mxu0 }
 0x1e3   :  { %1030 = vst [vmem:[#allocation6 + $0x58] sm:$0xff] %v1299_v50  ;;  %v950_v51 = vpop.f32.mrb[35].mxu0 }
 0x1e4   :  { %1029 = vst [vmem:[#allocation6 + $0x50] sm:$0xff] %v950_v51 }
 0x1e5   :  { %v1302_v52 = vpop.f32.mrb[24].mxu1 }
 0x1e6   :  { %1032 = vst [vmem:[#allocation6 + $0x68] sm:$0xff] %v1302_v52  ;;  %v960_v53 = vpop.f32.mrb[25].mxu1 }
 0x1e7   :  { %1031 = vst [vmem:[#allocation6 + $0x60] sm:$0xff] %v960_v53 }
 0x1ea   :  { %v1305_v54 = vpop.f32.mrb[26].mxu1 }
 0x1eb   :  { %1034 = vst [vmem:[#allocation6 + $0x78] sm:$0xff] %v1305_v54  ;;  %v970_v55 = vpop.f32.mrb[27].mxu1 }
 0x1ec   :  { %1033 = vst [vmem:[#allocation6 + $0x70] sm:$0xff] %v970_v55 }
 0x1ee   :  { %v1308_v56 = vpop.f32.mrb[28].mxu1 }
 0x1ef   :  { %1036 = vst [vmem:[#allocation6 + $0x88] sm:$0xff] %v1308_v56  ;;  %v980_v57 = vpop.f32.mrb[29].mxu1 }
 0x1f0   :  { %1035 = vst [vmem:[#allocation6 + $0x80] sm:$0xff] %v980_v57 }
 0x1f2   :  { %v1311_v58 = vpop.f32.mrb[30].mxu1 }
 0x1f3   :  { %1038 = vst [vmem:[#allocation6 + $0x98] sm:$0xff] %v1311_v58  ;;  %v990_v59 = vpop.f32.mrb[31].mxu1 }
 0x1f4   :  { %1037 = vst [vmem:[#allocation6 + $0x90] sm:$0xff] %v990_v59 }
 0x1f6   :  { %v1314_v60 = vpop.f32.mrb[32].mxu1 }
 0x1f7   :  { %1040 = vst [vmem:[#allocation6 + $0xa8] sm:$0xff] %v1314_v60  ;;  %v1000_v61 = vpop.f32.mrb[33].mxu1 }
 0x1f8   :  { %1039 = vst [vmem:[#allocation6 + $0xa0] sm:$0xff] %v1000_v61 }
 0x1fa   :  { %v1317_v62 = vpop.f32.mrb[34].mxu1 }
 0x1fb   :  { %1042 = vst [vmem:[#allocation6 + $0xb8] sm:$0xff] %v1317_v62  ;;  %v1010_v63 = vpop.f32.mrb[35].mxu1 }
 0x1fc   :  { %1041 = vst [vmem:[#allocation6 + $0xb0] sm:$0xff] %v1010_v63 }
 0x1fd   :  { %1388 = shalt.err (!%p1385_p12)
}
 0x1fe   :  { %s1389_s11 = scalar_lea.hbm %s1618_s3, 3072 }
 0x1ff   :  { %p1390_p13 = scmp.ne.s32.totalorder %s1618_s3, %s1389_s11  ;;  %p1393_p0 = scmp.lt.u32.totalorder %s1389_s11, %s1618_s3 }
 0x201   :  { %p1395_p1 = pnand %p1393_p0, %p1390_p13 }
 0x203   :  { %1398 = shalt.err (!%p1395_p1)
}
 0x204   :  { %1054 = dma.vmem_to_hbm [thread:$0]  %s1049_s7, 3072, %s1618_s3, [#allocation5], %s1404_s22, %s1404_s22, %s1405_s23  }
 0x205   :  { %1401 = dma.done.wait [#allocation5], 3072  }
 0x206   :  { %1402 = vsyncadd [#allocation5], 4294964224 }
 0x207   :  { %1058 = vsyncpa [#allocation4], 1 }
 0x208   :  { %1059 = vsyncpa [#allocation5], 1 }

</bundles_post_ra>
